<compile_context>
chip_gen: v7x
topology: tpu7x:2x2x1
jax: 0.10.0
libtpu: 0.0.40
codegen_flags: <defaults>
</compile_context>

<pallas_src>
import functools

import numpy as np
import jax
import jax.numpy as jnp
from jax import lax
from jax.experimental import pallas as pl
from jax.experimental.pallas import tpu as pltpu


def _softmax_weights(dist, mask):
    # mirrors softmax_weights() from the PyTorch reference; exp computed once,
    # divide replaced by approx reciprocal + one Newton refinement (EUP slot).
    max_v = jnp.max(dist * mask, axis=1, keepdims=True)
    e = jnp.exp(dist - max_v) * mask
    z = jnp.sum(e, axis=1, keepdims=True) + 1e-6
    r = pl.reciprocal(z, approx=True)
    r = r * (2.0 - z * r)                      # Newton step -> ~f32-exact
    return e * r


def _triplet_adp_kernel(alpha, gamma, x_blk_ref, x_all_ref, trow_ref, tcol_ref,
                        out_ref):
    xb = x_blk_ref[...]                        # [tm, D] rows of this grid step
    xa = x_all_ref[...]                        # [N,  D] full batch (resident)

    # pdist_torch slice: dist[i, j] for i in this row block, all j
    sq_b = jnp.sum(xb * xb, axis=1, keepdims=True)               # [tm, 1]
    sq_a = jnp.sum(xa * xa, axis=1, keepdims=True)               # [N, 1]
    gram = lax.dot_general(xb, xa, (((1,), (1,)), ((), ())),
                           preferred_element_type=jnp.float32)   # [tm, N]
    d2 = sq_b + jnp.transpose(sq_a) - 2.0 * gram
    dist = jnp.sqrt(jnp.maximum(d2, 1e-12))

    # masks built in-kernel from O(N) target vectors (no N x N HBM input)
    is_pos = (trow_ref[...] == tcol_ref[...]).astype(jnp.float32)  # [tm, N]
    is_neg = 1.0 - is_pos

    dist_ap = dist * is_pos
    dist_an = dist * is_neg
    w_ap = _softmax_weights(dist_ap * alpha, is_pos)
    w_an = _softmax_weights(-dist_an * alpha, is_neg)
    fp = jnp.sum(dist_ap * w_ap, axis=1, keepdims=True)          # [tm, 1]
    cn = jnp.sum(dist_an * w_an, axis=1, keepdims=True)          # [tm, 1]

    # per-row SoftMarginLoss term (y = 1): softplus(-gamma*(cn - fp)), stable
    t = gamma * (fp - cn)
    sp = jnp.maximum(t, 0.0) + jnp.log1p(jnp.exp(-jnp.abs(t)))   # [tm, 1]
    corr = (cn >= fp).astype(jnp.float32)                        # [tm, 1]

    # single lane-dense output slab: col0=fp, col1=cn, col2=loss term, col3=correct
    tm = fp.shape[0]
    lane = lax.broadcasted_iota(jnp.int32, (tm, 128), 1)
    out_ref[...] = (fp * (lane == 0).astype(jnp.float32)
                    + cn * (lane == 1).astype(jnp.float32)
                    + sp * (lane == 2).astype(jnp.float32)
                    + corr * (lane == 3).astype(jnp.float32))


def triplet_loss_adp(inputs, targets, local_features=None,
                     normalize_feature=False, alpha=1.0, gamma=1.0, square=0):
    """Forward pass of TripletLoss_ADP0 (weighted-triplet / SoftMargin branch).

    Returns (loss, local_loss, correct, aux).
    """
    inputs = jnp.asarray(inputs, jnp.float32)
    if normalize_feature:
        inputs = inputs / (jnp.linalg.norm(inputs, axis=-1, keepdims=True) + 1e-12)

    N, D = inputs.shape
    targets = jnp.asarray(targets, jnp.int32)
    t_row = targets.reshape(N, 1)                                # [N, 1]
    t_col = targets.reshape(1, N)                                # [1, N]

    block_m = N if N <= 128 else 128
    grid_m = pl.cdiv(N, block_m)

    kernel = functools.partial(_triplet_adp_kernel, float(alpha), float(gamma))
    slab = pl.pallas_call(
        kernel,
        out_shape=jax.ShapeDtypeStruct((N, 128), jnp.float32),
        grid=(grid_m,),
        in_specs=[
            pl.BlockSpec((block_m, D), lambda i: (i, 0)),   # row block of features
            pl.BlockSpec((N, D), lambda i: (0, 0)),         # full features (resident)
            pl.BlockSpec((block_m, 1), lambda i: (i, 0)),   # targets for these rows
            pl.BlockSpec((1, N), lambda i: (0, 0)),         # targets for all columns
        ],
        out_specs=pl.BlockSpec((block_m, 128), lambda i: (i, 0)),
        compiler_params=pltpu.CompilerParams(dimension_semantics=("parallel",)),
    )(inputs, inputs, t_row, t_col)

    fp = slab[:, 0]
    cn = slab[:, 1]
    if square == 0:
        loss = jnp.mean(slab[:, 2])
    else:
        diff_pow = jnp.minimum((fp - cn) ** 2 * gamma, 44.0)
        y = jnp.where(fp > cn, -1.0, 1.0)
        loss = jnp.mean(jnp.log1p(jnp.exp(-y * diff_pow)))
    correct = int(jnp.sum(slab[:, 3]))

    # TODO(synk): local-feature branch (hard_example_mining / batch_local_dist1 /
    # MarginRankingLoss) has no definition in the provided reference; local_loss
    # is returned as 0.0 instead of being faked.
    local_loss = jnp.float32(0.0)
    aux = {"furthest_positive": fp, "closest_negative": cn}
    return loss, local_loss, correct, aux


def _numpy_reference(inputs, targets, alpha=1.0, gamma=1.0):
    """Pure-numpy float64 reference of the implemented branch (square == 0)."""
    x = np.asarray(inputs, np.float64)
    sq = (x ** 2).sum(axis=1, keepdims=True)
    dist = np.sqrt(np.clip(sq + sq.T - 2.0 * x @ x.T, 1e-12, None))
    t = np.asarray(targets)
    is_pos = (t[:, None] == t[None, :]).astype(np.float64)
    is_neg = 1.0 - is_pos

    def sw(d, m):
        mv = (d * m).max(axis=1, keepdims=True)
        e = np.exp(d - mv) * m
        z = e.sum(axis=1, keepdims=True) + 1e-6
        return e / z

    dap, dan = dist * is_pos, dist * is_neg
    fp = (dap * sw(dap * alpha, is_pos)).sum(axis=1)
    cn = (dan * sw(-dan * alpha, is_neg)).sum(axis=1)
    loss = np.mean(np.log1p(np.exp(-gamma * (cn - fp))))
    correct = int((cn >= fp).sum())
    return loss, correct, fp, cn


if __name__ == "__main__":
    # Small shapes: 6 identities x 4 samples, feature dim 32.
    num_ids, per_id, D = 6, 4, 32
    N = num_ids * per_id                              # 24

    key = jax.random.PRNGKey(0)
    k_in, k_loc = jax.random.split(key)
    inputs = jax.random.normal(k_in, (N, D), jnp.float32)
    targets = np.repeat(np.arange(num_ids), per_id).astype(np.int32)
    # local features are only consumed by the (unimplemented) local branch
    local_features = jax.random.normal(k_loc, (N, 16, 6), jnp.float32)

    loss, local_loss, correct, aux = triplet_loss_adp(inputs, targets, local_features)
    jax.block_until_ready((loss, aux["furthest_positive"], aux["closest_negative"]))

    ref_loss, ref_correct, ref_fp, ref_cn = _numpy_reference(np.asarray(inputs), targets)

    assert np.isfinite(float(loss))
    assert abs(float(loss) - ref_loss) < 2e-2, (float(loss), ref_loss)
    assert correct == ref_correct, (correct, ref_correct)
    assert np.allclose(np.asarray(aux["furthest_positive"]), ref_fp, atol=2e-2)
    assert np.allclose(np.asarray(aux["closest_negative"]), ref_cn, atol=2e-2)

    print("KERNEL_OK")
</pallas_src>

<mosaic_0001>
module attributes {stable_mosaic.version = 11 : i64} {
  func.func @_triplet_adp_kernel(%arg0: i32, %arg1: memref<24x32xf32, #tpu.memory_space<vmem>>, %arg2: memref<24x32xf32, #tpu.memory_space<vmem>>, %arg3: memref<24x1xi32, #tpu.memory_space<vmem>>, %arg4: memref<1x24xi32, #tpu.memory_space<vmem>>, %arg5: memref<24x128xf32, #tpu.memory_space<vmem>>) attributes {dimension_semantics = [#tpu.dimension_semantics<parallel>], iteration_bounds = array<i64: 1>, scalar_prefetch = 0 : i64, scratch_operands = 0 : i64, tpu.core_type = #tpu.core_type<tc>, window_params = [{transform_indices = @transform_0, window_bounds = array<i64: 24, 32>}, {pipeline_mode = #tpu.pipeline_mode<synchronous>, transform_indices = @transform_1, window_bounds = array<i64: 24, 32>}, {transform_indices = @transform_2, window_bounds = array<i64: 24, 1>}, {pipeline_mode = #tpu.pipeline_mode<synchronous>, transform_indices = @transform_3, window_bounds = array<i64: 1, 24>}, {transform_indices = @transform_4, window_bounds = array<i64: 24, 128>}]} {
    %c0 = arith.constant 0 : index
    %c0_0 = arith.constant 0 : index
    %0 = vector.load %arg1[%c0, %c0_0] : memref<24x32xf32, #tpu.memory_space<vmem>>, vector<24x32xf32>
    %c0_1 = arith.constant 0 : index
    %c0_2 = arith.constant 0 : index
    %1 = vector.load %arg2[%c0_1, %c0_2] : memref<24x32xf32, #tpu.memory_space<vmem>>, vector<24x32xf32>
    %2 = arith.mulf %0, %0 : vector<24x32xf32>
    %cst = arith.constant dense<0.000000e+00> : vector<24xf32>
    %3 = vector.multi_reduction <add>, %2, %cst [1] : vector<24x32xf32> to vector<24xf32>
    %4 = vector.shape_cast %3 : vector<24xf32> to vector<24x1xf32>
    %5 = arith.mulf %1, %1 : vector<24x32xf32>
    %cst_3 = arith.constant dense<0.000000e+00> : vector<24xf32>
    %6 = vector.multi_reduction <add>, %5, %cst_3 [1] : vector<24x32xf32> to vector<24xf32>
    %7 = vector.shape_cast %6 : vector<24xf32> to vector<24x1xf32>
    %cst_4 = arith.constant dense<0.000000e+00> : vector<24x24xf32>
    %8 = tpu.matmul %0, %1, %cst_4 {dimension_numbers = #tpu.dot_dimension_numbers<[1], [1], [0], [0], [0, 0, 1, 0], [], []>} : vector<24x32xf32>, vector<24x32xf32>, vector<24x24xf32> -> vector<24x24xf32>
    %9 = tpu.transpose %7, [1, 0] : vector<24x1xf32> -> vector<1x24xf32>
    %10 = vector.broadcast %4 : vector<24x1xf32> to vector<24x24xf32>
    %11 = vector.broadcast %9 : vector<1x24xf32> to vector<24x24xf32>
    %12 = arith.addf %10, %11 : vector<24x24xf32>
    %cst_5 = arith.constant 2.000000e+00 : f32
    %13 = vector.broadcast %cst_5 : f32 to vector<24x24xf32>
    %14 = arith.mulf %13, %8 : vector<24x24xf32>
    %15 = arith.subf %12, %14 : vector<24x24xf32>
    %cst_6 = arith.constant 9.99999996E-13 : f32
    %16 = vector.broadcast %cst_6 : f32 to vector<24x24xf32>
    %17 = arith.maximumf %15, %16 : vector<24x24xf32>
    %18 = math.sqrt %17 : vector<24x24xf32>
    %c0_7 = arith.constant 0 : index
    %c0_8 = arith.constant 0 : index
    %19 = vector.load %arg3[%c0_7, %c0_8] : memref<24x1xi32, #tpu.memory_space<vmem>>, vector<24x1xi32>
    %c0_9 = arith.constant 0 : index
    %c0_10 = arith.constant 0 : index
    %20 = vector.load %arg4[%c0_9, %c0_10] : memref<1x24xi32, #tpu.memory_space<vmem>>, vector<1x24xi32>
    %21 = vector.broadcast %19 : vector<24x1xi32> to vector<24x24xi32>
    %22 = vector.broadcast %20 : vector<1x24xi32> to vector<24x24xi32>
    %23 = arith.cmpi eq, %21, %22 : vector<24x24xi32>
    %24 = arith.extui %23 : vector<24x24xi1> to vector<24x24xi32>
    %25 = arith.sitofp %24 : vector<24x24xi32> to vector<24x24xf32>
    %cst_11 = arith.constant 1.000000e+00 : f32
    %26 = vector.broadcast %cst_11 : f32 to vector<24x24xf32>
    %27 = arith.subf %26, %25 : vector<24x24xf32>
    %28 = arith.mulf %18, %25 : vector<24x24xf32>
    %29 = arith.mulf %18, %27 : vector<24x24xf32>
    %cst_12 = arith.constant 1.000000e+00 : f32
    %30 = vector.broadcast %cst_12 : f32 to vector<24x24xf32>
    %31 = arith.mulf %28, %30 : vector<24x24xf32>
    %32 = arith.mulf %31, %25 : vector<24x24xf32>
    %cst_13 = arith.constant dense<0xFF800000> : vector<24xf32>
    %33 = vector.multi_reduction <maximumf>, %32, %cst_13 [1] : vector<24x24xf32> to vector<24xf32>
    %34 = vector.shape_cast %33 : vector<24xf32> to vector<24x1xf32>
    %35 = vector.broadcast %34 : vector<24x1xf32> to vector<24x24xf32>
    %36 = arith.subf %31, %35 : vector<24x24xf32>
    %37 = math.exp %36 : vector<24x24xf32>
    %38 = arith.mulf %37, %25 : vector<24x24xf32>
    %cst_14 = arith.constant dense<0.000000e+00> : vector<24xf32>
    %39 = vector.multi_reduction <add>, %38, %cst_14 [1] : vector<24x24xf32> to vector<24xf32>
    %40 = vector.shape_cast %39 : vector<24xf32> to vector<24x1xf32>
    %cst_15 = arith.constant 9.99999997E-7 : f32
    %41 = vector.broadcast %cst_15 : f32 to vector<24x1xf32>
    %42 = arith.addf %40, %41 : vector<24x1xf32>
    %43 = tpu.reciprocal %42 {approx = true} : vector<24x1xf32> -> vector<24x1xf32>
    %44 = arith.mulf %42, %43 : vector<24x1xf32>
    %cst_16 = arith.constant 2.000000e+00 : f32
    %45 = vector.broadcast %cst_16 : f32 to vector<24x1xf32>
    %46 = arith.subf %45, %44 : vector<24x1xf32>
    %47 = arith.mulf %43, %46 : vector<24x1xf32>
    %48 = vector.broadcast %47 : vector<24x1xf32> to vector<24x24xf32>
    %49 = arith.mulf %38, %48 : vector<24x24xf32>
    %cst_17 = arith.constant 0.000000e+00 : f32
    %50 = vector.broadcast %cst_17 : f32 to vector<24x24xf32>
    %51 = arith.subf %50, %29 : vector<24x24xf32>
    %cst_18 = arith.constant 1.000000e+00 : f32
    %52 = vector.broadcast %cst_18 : f32 to vector<24x24xf32>
    %53 = arith.mulf %51, %52 : vector<24x24xf32>
    %54 = arith.mulf %53, %27 : vector<24x24xf32>
    %cst_19 = arith.constant dense<0xFF800000> : vector<24xf32>
    %55 = vector.multi_reduction <maximumf>, %54, %cst_19 [1] : vector<24x24xf32> to vector<24xf32>
    %56 = vector.shape_cast %55 : vector<24xf32> to vector<24x1xf32>
    %57 = vector.broadcast %56 : vector<24x1xf32> to vector<24x24xf32>
    %58 = arith.subf %53, %57 : vector<24x24xf32>
    %59 = math.exp %58 : vector<24x24xf32>
    %60 = arith.mulf %59, %27 : vector<24x24xf32>
    %cst_20 = arith.constant dense<0.000000e+00> : vector<24xf32>
    %61 = vector.multi_reduction <add>, %60, %cst_20 [1] : vector<24x24xf32> to vector<24xf32>
    %62 = vector.shape_cast %61 : vector<24xf32> to vector<24x1xf32>
    %cst_21 = arith.constant 9.99999997E-7 : f32
    %63 = vector.broadcast %cst_21 : f32 to vector<24x1xf32>
    %64 = arith.addf %62, %63 : vector<24x1xf32>
    %65 = tpu.reciprocal %64 {approx = true} : vector<24x1xf32> -> vector<24x1xf32>
    %66 = arith.mulf %64, %65 : vector<24x1xf32>
    %cst_22 = arith.constant 2.000000e+00 : f32
    %67 = vector.broadcast %cst_22 : f32 to vector<24x1xf32>
    %68 = arith.subf %67, %66 : vector<24x1xf32>
    %69 = arith.mulf %65, %68 : vector<24x1xf32>
    %70 = vector.broadcast %69 : vector<24x1xf32> to vector<24x24xf32>
    %71 = arith.mulf %60, %70 : vector<24x24xf32>
    %72 = arith.mulf %28, %49 : vector<24x24xf32>
    %cst_23 = arith.constant dense<0.000000e+00> : vector<24xf32>
    %73 = vector.multi_reduction <add>, %72, %cst_23 [1] : vector<24x24xf32> to vector<24xf32>
    %74 = vector.shape_cast %73 : vector<24xf32> to vector<24x1xf32>
    %75 = arith.mulf %29, %71 : vector<24x24xf32>
    %cst_24 = arith.constant dense<0.000000e+00> : vector<24xf32>
    %76 = vector.multi_reduction <add>, %75, %cst_24 [1] : vector<24x24xf32> to vector<24xf32>
    %77 = vector.shape_cast %76 : vector<24xf32> to vector<24x1xf32>
    %78 = arith.subf %74, %77 : vector<24x1xf32>
    %cst_25 = arith.constant 1.000000e+00 : f32
    %79 = vector.broadcast %cst_25 : f32 to vector<24x1xf32>
    %80 = arith.mulf %79, %78 : vector<24x1xf32>
    %cst_26 = arith.constant 0.000000e+00 : f32
    %81 = vector.broadcast %cst_26 : f32 to vector<24x1xf32>
    %82 = arith.maximumf %80, %81 : vector<24x1xf32>
    %83 = math.absf %80 : vector<24x1xf32>
    %cst_27 = arith.constant 0.000000e+00 : f32
    %84 = vector.broadcast %cst_27 : f32 to vector<24x1xf32>
    %85 = arith.subf %84, %83 : vector<24x1xf32>
    %86 = math.exp %85 : vector<24x1xf32>
    %87 = math.log1p %86 : vector<24x1xf32>
    %88 = arith.addf %82, %87 : vector<24x1xf32>
    %89 = arith.cmpf oge, %77, %74 : vector<24x1xf32>
    %90 = arith.extui %89 : vector<24x1xi1> to vector<24x1xi32>
    %91 = arith.sitofp %90 : vector<24x1xi32> to vector<24x1xf32>
    %92 = tpu.iota {dimensions = array<i32: 1>} : vector<24x128xi32>
    %c0_i32 = arith.constant 0 : i32
    %93 = vector.broadcast %c0_i32 : i32 to vector<24x128xi32>
    %94 = arith.cmpi eq, %92, %93 : vector<24x128xi32>
    %95 = arith.extui %94 : vector<24x128xi1> to vector<24x128xi32>
    %96 = arith.sitofp %95 : vector<24x128xi32> to vector<24x128xf32>
    %97 = vector.broadcast %74 : vector<24x1xf32> to vector<24x128xf32>
    %98 = arith.mulf %97, %96 : vector<24x128xf32>
    %c1_i32 = arith.constant 1 : i32
    %99 = vector.broadcast %c1_i32 : i32 to vector<24x128xi32>
    %100 = arith.cmpi eq, %92, %99 : vector<24x128xi32>
    %101 = arith.extui %100 : vector<24x128xi1> to vector<24x128xi32>
    %102 = arith.sitofp %101 : vector<24x128xi32> to vector<24x128xf32>
    %103 = vector.broadcast %77 : vector<24x1xf32> to vector<24x128xf32>
    %104 = arith.mulf %103, %102 : vector<24x128xf32>
    %105 = arith.addf %98, %104 : vector<24x128xf32>
    %c2_i32 = arith.constant 2 : i32
    %106 = vector.broadcast %c2_i32 : i32 to vector<24x128xi32>
    %107 = arith.cmpi eq, %92, %106 : vector<24x128xi32>
    %108 = arith.extui %107 : vector<24x128xi1> to vector<24x128xi32>
    %109 = arith.sitofp %108 : vector<24x128xi32> to vector<24x128xf32>
    %110 = vector.broadcast %88 : vector<24x1xf32> to vector<24x128xf32>
    %111 = arith.mulf %110, %109 : vector<24x128xf32>
    %112 = arith.addf %105, %111 : vector<24x128xf32>
    %c3_i32 = arith.constant 3 : i32
    %113 = vector.broadcast %c3_i32 : i32 to vector<24x128xi32>
    %114 = arith.cmpi eq, %92, %113 : vector<24x128xi32>
    %115 = arith.extui %114 : vector<24x128xi1> to vector<24x128xi32>
    %116 = arith.sitofp %115 : vector<24x128xi32> to vector<24x128xf32>
    %117 = vector.broadcast %91 : vector<24x1xf32> to vector<24x128xf32>
    %118 = arith.mulf %117, %116 : vector<24x128xf32>
    %119 = arith.addf %112, %118 : vector<24x128xf32>
    %c0_28 = arith.constant 0 : index
    %c0_29 = arith.constant 0 : index
    %120 = vector.load %arg5[%c0_28, %c0_29] : memref<24x128xf32, #tpu.memory_space<vmem>>, vector<24x128xf32>
    tpu.vector_store %arg5[%c0_28, %c0_29], %119 {strides = array<i32>} : memref<24x128xf32, #tpu.memory_space<vmem>>, vector<24x128xf32>,
    return
  }
  func.func @transform_0(%arg0: i32) -> (i32, i32) {
    %c0_i32 = arith.constant 0 : i32
    %c0_i32_0 = arith.constant 0 : i32
    return %arg0, %c0_i32 : i32, i32
  }
  func.func @transform_1(%arg0: i32) -> (i32, i32) {
    %c0_i32 = arith.constant 0 : i32
    %c0_i32_0 = arith.constant 0 : i32
    %c0_i32_1 = arith.constant 0 : i32
    return %c0_i32, %c0_i32_0 : i32, i32
  }
  func.func @transform_2(%arg0: i32) -> (i32, i32) {
    %c0_i32 = arith.constant 0 : i32
    %c0_i32_0 = arith.constant 0 : i32
    return %arg0, %c0_i32 : i32, i32
  }
  func.func @transform_3(%arg0: i32) -> (i32, i32) {
    %c0_i32 = arith.constant 0 : i32
    %c0_i32_0 = arith.constant 0 : i32
    %c0_i32_1 = arith.constant 0 : i32
    return %c0_i32, %c0_i32_0 : i32, i32
  }
  func.func @transform_4(%arg0: i32) -> (i32, i32) {
    %c0_i32 = arith.constant 0 : i32
    %c0_i32_0 = arith.constant 0 : i32
    return %arg0, %c0_i32 : i32, i32
  }
}

</mosaic_0001>

<bundles_post_ra>
// kernel: tpu_custom_call.1
= control target key start
LH: loop header
LB: loop body
LE: loop exit
PB: predicated region body
PF: predicated region fallthrough
CT: control target
= control target key end

     0   :  { %9 = vsyncpa [#allocation3], 0  ;;  %s882_s0 = inlined_call_operand.vmem [shape: f32[24,32], index: 0, kind: input, shape index: {}]   ;;  %s883_s1 = inlined_call_operand.hbm [shape: f32[24,32], index: 1, kind: input, shape index: {}]   ;;  %s884_s2 = inlined_call_operand.vmem [shape: s32[24,1], index: 2, kind: input, shape index: {}]   ;;  %s885_s3 = inlined_call_operand.vmem [shape: s32[1,24], index: 3, kind: input, shape index: {}]   ;;  %s886_s4 = inlined_call_operand.hbm [shape: f32[24,128], index: 4, kind: output, shape index: {}]  }
   0x1   :  { %10 = vsyncpa [#allocation4], 0  ;;  %s653_s15 = smov [#allocation2]   ;;  %s605_s19 = scalar_lea.hbm %s883_s1, 384 }
   0x2   :  { %s18_s16 = sshll.u32 %s653_s15, 4  ;;  %p606_p0 = scmp.ne.s32.totalorder %s883_s1, %s605_s19  ;;  %s19_s16 = int_to_ptr.vmem [resolvable:$true] %s18_s16 }
   0x3   :  { %p609_p1 = scmp.lt.u32.totalorder %s605_s19, %s883_s1 }
   0x5   :  { %p611_p2 = pnand %p609_p1, %p606_p0 }
   0x7   :  { %614 = shalt.err (!%p611_p2)
}
   0x8   :  { %s615_s24 = scalar_lea.vmem %s19_s16, 384  ;;  %p620_p4 = scmp.lt.s32.totalorder %s19_s16, %s19_s16 }
   0x9   :  { %p616_p3 = scmp.ne.s32.totalorder %s19_s16, %s615_s24  ;;  %p621_p5 = scmp.lt.s32.totalorder %s615_s24, %s615_s24 }
   0xb   :  { %p622_p6 = por %p621_p5, %p620_p4 }
   0xd   :  { %p623_p7 = pnand %p622_p6, %p616_p3 }
   0xf   :  { %626 = shalt.err (!%p623_p7)
}
  0x10   :  { %s654_s25 = smov 128   ;;  %s655_s26 = smov 8  }
  0x11   :  { %24 = dma.hbm_to_vmem [thread:$0]  %s883_s1, 384, %s19_s16, [#allocation3], %s654_s25, %s654_s25, %s655_s26  }
  0x12   :  { %649 = dma.done.wait [#allocation3], 384  }
  0x13   :  { %650 = vsyncadd [#allocation3], 4294966912  ;;  %v656_v0 = vmov 0.0|0.0   ;;  %vm657_vm0 = vmmov 0   ;;  %v658_v1 = vmov 0.0   ;;  %v659_v2 = vmov 0  }
  0x14   :  { %549 = vmatprep.subr.bf16.mxu1 %v656_v0  ;;  %545 = vmatprep.subr.bf16.mxu0 %v656_v0  ;;  %vm41_vm1 = vcmask 261120   ;;  %v35_v3 = vld [vmem:[#allocation2] sm:$0xff]  ;;  %v36_v4 = vld [vmem:[#allocation2 + $0x8] sm:$0xff]  ;;  %v37_v5 = vld [vmem:[#allocation2 + $0x10] sm:$0xff]  ;;  %v193_v36 = vlaneseq  ;;  %vm268_vm11 = vcmask 195584  }
  0x15   :  { %539 = vmatprep.mubr.msk.f32.mxu1 %vm657_vm0, %v658_v1  ;;  %536 = vmatprep.mubr.msk.f32.mxu0 %vm657_vm0, %v658_v1  ;;  %vm547_vm2 = vmpackc.low %vm41_vm1, %vm41_vm1  ;;  %v51_v6 = vmul.f32 %v35_v3, %v35_v3  ;;  %v52_v7 = vmul.f32 %v36_v4, %v36_v4  ;;  %v53_v8 = vmul.f32 %v37_v5, %v37_v5  ;;  %v32_v10 = vld [vmem:[%s882_s0] sm:$0xff]  ;;  %v33_v14 = vld [vmem:[%s882_s0 + $0x8] sm:$0xff] }
  0x16   :  { %562 = vset.pattern.permute.xlu1 %v659_v2  ;;  %561 = vset.pattern.permute.xlu0 %v659_v2  ;;  %v546_v9 = vpack.c.bf16 %v36_v4, %v35_v3  ;;  %v38_v11 = vmul.f32 %v32_v10, %v32_v10  ;;  %v34_v15 = vld [vmem:[%s882_s0 + $0x10] sm:$0xff]  ;;  %v39_v19 = vmul.f32 %v33_v14, %v33_v14  ;;  %v231_v22 = vld [vmem:[%s884_s2 + $0x8] sm:$0xff]  ;;  %v230_v24 = vld [vmem:[%s884_s2] sm:$0xff]  ;;  %v194_v38 = vshrl.u32 %v193_v36, 7 }
  0x17   :  { %v54_v12 = vsel %vm41_vm1, %v51_v6, 0.0  ;;  %v60_v13 = vsel %vm41_vm1, %v53_v8, 0.0  ;;  %v57_v16 = vsel %vm41_vm1, %v52_v7, 0.0  ;;  %v40_v18 = vmul.f32 %v34_v15, %v34_v15  ;;  %v232_v23 = vld [vmem:[%s884_s2 + $0x10] sm:$0xff]  ;;  %v513_v57 = vld [vmem:[%s885_s3] ss:$0 sm:$0xff] }
  0x18   :  { %551 = vmatpush3.bf16.xpose.msk.msra.mxu1 %vm547_vm2, %v546_v9  ;;  %548 = vmatpush3.bf16.xpose.msk.msra.mxu0 %vm547_vm2, %v546_v9  ;;  %v42_v17 = vsel %vm41_vm1, %v38_v11, 0.0  ;;  %v45_v21 = vsel %vm41_vm1, %v39_v19, 0.0  ;;  %v195_v40 = vsub.s32 0, %v194_v38  ;;  %s660_s3 = smov [#allocation5]  }
  0x19   :  { %55 = vadd.xlane.f32.xlu0 %v54_v12  ;;  %61 = vadd.xlane.f32.xlu1 %v60_v13  ;;  %v48_v20 = vsel %vm41_vm1, %v40_v18, 0.0  ;;  %s495_s14 = sshll.u32 %s660_s3, 4  ;;  %s496_s14 = int_to_ptr.vmem [resolvable:$true] %s495_s14 }
  0x1a   :  { %550 = vmatprep.subr.mxu1 %v658_v1  ;;  %534 = vmatprep.subr.mxu0 %v658_v1  ;;  %s627_s15 = scalar_lea.vmem %s496_s14, 384  ;;  %p632_p9 = scmp.lt.s32.totalorder %s496_s14, %s496_s14 }
  0x1b   :  { %p628_p8 = scmp.ne.s32.totalorder %s496_s14, %s627_s15  ;;  %p633_p10 = scmp.lt.s32.totalorder %s627_s15, %s627_s15 }
  0x1d   :  { %58 = vadd.xlane.f32.xlu0 %v57_v16  ;;  %43 = vadd.xlane.f32.xlu1 %v42_v17  ;;  %p634_p11 = por %p633_p10, %p632_p9 }
  0x1f   :  { %p635_p12 = pnand %p634_p11, %p628_p8 }
  0x20   :  { %552 = vmatpush3.xpose.msk.msra.mxu1 %vm41_vm1, %v37_v5  ;;  %535 = vmatpush3.xpose.msk.msra.mxu0 %vm41_vm1, %v37_v5 }
  0x21   :  { %49 = vadd.xlane.f32.xlu1 %v48_v20  ;;  %46 = vadd.xlane.f32.xlu0 %v45_v21 }
  0x23   :  { %540 = vmatmul.mubr.msk.f32.vlgmr.msra.gmra.mrb[0].mxu1 %vm41_vm1, %v33_v14  ;;  %537 = vmatmul.mubr.msk.f32.vlgmr.msra.gmra.mrb[0].mxu0 %vm41_vm1, %v32_v10 }
  0x24   :  { %542 = vmatprep.mubr.msk.f32.mxu1 %vm657_vm0, %v658_v1 }
  0x27   :  { %543 = vmatmul.mubr.msk.f32.gmra.mrb[2].mxu1 %vm41_vm1, %v34_v15 }
  0x32   :  { %238 = vperm.xlu1 %562, %v231_v22  }
  0x36   :  { %241 = vperm.xlu1 %562, %v232_v23  }
  0x37   :  { %235 = vperm.xlu0 %561, %v230_v24  }
  0xa6   :  { %v56_v25 = vpop.xlane.xlu0 %55  ;;  %v62_v27 = vpop.xlane.xlu1 %61 }
  0xa7   :  { %161 = vxpose.xlu1.b32.start [1/3] (short) (narrow) %v56_v25, 8 }
  0xaa   :  { %v59_v26 = vpop.xlane.xlu0 %58  ;;  %v44_v34 = vpop.xlane.xlu1 %43 }
  0xab   :  { %162 = vxpose.xlu1.b32.cont [2/3] (short) (narrow) %v59_v26, 8 }
  0xae   :  { %v50_v35 = vpop.xlane.xlu1 %49  ;;  %v47_v42 = vpop.xlane.xlu0 %46 }
  0xaf   :  { %163 = vxpose.xlu1.b32.end [3/3] (short) (narrow) %v62_v27, 8 }
  0xb2   :  { %v239_v37 = vpop.permute.xlu1 %238 }
  0xb3   :  { %vm248_vm4 = vcmp.eq.s32.totalorder %v239_v37, %v513_v57 }
  0xb4   :  { %v748_v59 = vsel %vm248_vm4, 1.0, %v658_v1 }
  0xb5   :  { %v754_v2 = vsub.f32 1.0, %v748_v59 }
  0xb6   :  { %v242_v39 = vpop.permute.xlu1 %241  ;;  %v236_v56 = vpop.permute.xlu0 %235 }
  0xb7   :  { %vm247_vm3 = vcmp.eq.s32.totalorder %v236_v56, %v513_v57  ;;  %vm249_vm6 = vcmp.eq.s32.totalorder %v242_v39, %v513_v57 }
  0xb8   :  { %v745_v58 = vsel %vm247_vm3, 1.0, %v658_v1  ;;  %v773_v18 = vsel %vm249_vm6, 1.0, %v658_v1 }
  0xb9   :  { %v751_v63 = vsub.f32 1.0, %v745_v58  ;;  %v258_v25 = vsub.f32 1.0, %v773_v18 }
  0xf6   :  { %v152_v28 = vpop.f32.mrb[0].mxu1  ;;  %v147_v29 = vpop.f32.mrb[0].mxu0 }
  0xf7   :  { %v541_v30 = vpop.f32.mrb[1].mxu1  ;;  %v538_v31 = vpop.f32.mrb[1].mxu0  ;;  %v201_v43 = vmul.f32 2.0, %v152_v28  ;;  %v200_v45 = vmul.f32 2.0, %v147_v29 }
  0xfa   :  { %v157_v32 = vpop.f32.mrb[2].mxu1 }
  0xfb   :  { %v544_v33 = vpop.f32.mrb[3].mxu1  ;;  %v202_v46 = vmul.f32 2.0, %v157_v32 }
 0x127   :  { %v177_v41 = vpop.trf.xlu1 }
 0x128   :  { %v196_v44 = vrot.slane %v177_v41, %v195_v40 }
 0x12a   :  { %v197_v47 = vadd.f32 %v196_v44, %v44_v34  ;;  %v199_v48 = vadd.f32 %v196_v44, %v50_v35  ;;  %v198_v49 = vadd.f32 %v196_v44, %v47_v42 }
 0x12c   :  { %v203_v50 = vsub.f32 %v197_v47, %v200_v45  ;;  %v205_v51 = vsub.f32 %v199_v48, %v202_v46  ;;  %v204_v52 = vsub.f32 %v198_v49, %v201_v43 }
 0x12e   :  { %v206_v53 = vmax.f32 %v203_v50, 1e-12  ;;  %v208_v54 = vmax.f32 %v205_v51, 1e-12  ;;  %v207_v55 = vmax.f32 %v204_v52, 1e-12 }
 0x130   :  { %563 = vrsqrt.f32 %v206_v53  ;;  %vm211_vm5 = vcmp.eq.f32.partialorder %v206_v53, inf  ;;  %v214_v3 = vand.u32 2147483648, %v206_v53  ;;  %vm213_vm7 = vcmp.eq.f32.partialorder %v206_v53, 0.0 }
 0x131   :  { %565 = vrsqrt.f32 %v208_v54  ;;  %vm218_vm8 = vcmp.eq.f32.partialorder %v207_v55, inf  ;;  %vm220_vm9 = vcmp.eq.f32.partialorder %v207_v55, 0.0  ;;  %v221_v8 = vand.u32 2147483648, %v207_v55 }
 0x132   :  { %567 = vrsqrt.f32 %v207_v55  ;;  %vm225_vm10 = vcmp.eq.f32.partialorder %v208_v54, inf  ;;  %vm227_vm12 = vcmp.eq.f32.partialorder %v208_v54, 0.0  ;;  %v228_v19 = vand.u32 2147483648, %v208_v54 }
 0x13a   :  { %v564_v60 = vpop.eup %563 }
 0x13b   :  { %v566_v61 = vpop.eup %565  ;;  %v210_v62 = vmul.f32 %v564_v60, %v206_v53 }
 0x13c   :  { %v568_v0 = vpop.eup %567  ;;  %v224_v4 = vmul.f32 %v566_v61, %v208_v54 }
 0x13d   :  { %v212_v5 = vsel %vm211_vm5, %v206_v53, %v210_v62  ;;  %v217_v6 = vmul.f32 %v568_v0, %v207_v55 }
 0x13e   :  { %v215_v7 = vsel %vm213_vm7, %v214_v3, %v212_v5  ;;  %v226_v13 = vsel %vm225_vm10, %v208_v54, %v224_v4 }
 0x13f   :  { %v757_v9 = vmul.f32 %v745_v58, %v215_v7  ;;  %v219_v10 = vsel %vm218_vm8, %v207_v55, %v217_v6  ;;  %v760_v11 = vmul.f32 %v751_v63, %v215_v7  ;;  %v229_v24 = vsel %vm227_vm12, %v228_v19, %v226_v13 }
 0x140   :  { %v222_v12 = vsel %vm220_vm9, %v221_v8, %v219_v10  ;;  %v785_v29 = vmul.f32 %v773_v18, %v229_v24  ;;  %v787_v30 = vmul.f32 %v258_v25, %v229_v24 }
 0x141   :  { %v763_v14 = vmul.f32 %v748_v59, %v222_v12  ;;  %v265_v15 = vmul.f32 %v745_v58, %v757_v9  ;;  %v317_v16 = vsub.f32 0.0, %v760_v11  ;;  %v769_v17 = vmul.f32 %v754_v2, %v222_v12 }
 0x142   :  { %v267_v32 = vmul.f32 %v773_v18, %v785_v29  ;;  %v319_v33 = vsub.f32 0.0, %v787_v30 }
 0x143   :  { %v266_v20 = vmul.f32 %v748_v59, %v763_v14  ;;  %v269_v21 = vsel %vm268_vm11, %v265_v15, -inf  ;;  %v320_v22 = vmul.f32 %v317_v16, %v751_v63  ;;  %v318_v23 = vsub.f32 0.0, %v769_v17 }
 0x144   :  { %270 = vmax.xlane.f32.xlu0 %v269_v21  ;;  %v275_v34 = vsel %vm268_vm11, %v267_v32, -inf  ;;  %v322_v35 = vmul.f32 %v319_v33, %v258_v25 }
 0x145   :  { %v272_v26 = vsel %vm268_vm11, %v266_v20, -inf  ;;  %v323_v27 = vsel %vm268_vm11, %v320_v22, -inf  ;;  %v321_v28 = vmul.f32 %v318_v23, %v754_v2 }
 0x146   :  { %273 = vmax.xlane.f32.xlu1 %v272_v26  ;;  %v329_v37 = vsel %vm268_vm11, %v322_v35, -inf }
 0x147   :  { %v326_v31 = vsel %vm268_vm11, %v321_v28, -inf }
 0x148   :  { %324 = vmax.xlane.f32.xlu0 %v323_v27 }
 0x14c   :  { %327 = vmax.xlane.f32.xlu0 %v326_v31 }
 0x150   :  { %276 = vmax.xlane.f32.xlu0 %v275_v34 }
 0x154   :  { %330 = vmax.xlane.f32.xlu0 %v329_v37 }
 0x1d1   :  { %v271_v38 = vpop.xlane.xlu0 %270 }
 0x1d2   :  { %v278_v39 = vsub.f32 %v757_v9, %v271_v38 }
 0x1d3   :  { %v274_v40 = vpop.xlane.xlu1 %273 }
 0x1d4   :  { %v279_v41 = vsub.f32 %v763_v14, %v274_v40  ;;  %v281_v42 = vmul.f32 1.442695, %v278_v39 }
 0x1d5   :  { %v325_v43 = vpop.xlane.xlu0 %324 }
 0x1d6   :  { %v283_v44 = vmul.f32 1.442695, %v279_v41  ;;  %569 = vpow2.f32 %v281_v42  ;;  %v332_v45 = vsub.f32 %v317_v16, %v325_v43 }
 0x1d8   :  { %571 = vpow2.f32 %v283_v44  ;;  %v335_v46 = vmul.f32 1.442695, %v332_v45 }
 0x1d9   :  { %v328_v47 = vpop.xlane.xlu0 %327 }
 0x1da   :  { %573 = vpow2.f32 %v335_v46  ;;  %v333_v48 = vsub.f32 %v318_v23, %v328_v47 }
 0x1dc   :  { %v337_v49 = vmul.f32 1.442695, %v333_v48 }
 0x1dd   :  { %v277_v50 = vpop.xlane.xlu0 %276 }
 0x1de   :  { %v280_v51 = vsub.f32 %v785_v29, %v277_v50  ;;  %575 = vpow2.f32 %v337_v49 }
 0x1e0   :  { %v570_v52 = vpop.eup %569  ;;  %v285_v53 = vmul.f32 1.442695, %v280_v51 }
 0x1e1   :  { %v331_v54 = vpop.xlane.xlu0 %330  ;;  %v287_v55 = vmul.f32 %v570_v52, %v745_v58 }
 0x1e2   :  { %v572_v56 = vpop.eup %571  ;;  %577 = vpow2.f32 %v285_v53  ;;  %v334_v57 = vsub.f32 %v319_v33, %v331_v54 }
 0x1e3   :  { %v290_v60 = vsel %vm268_vm11, %v287_v55, 0.0  ;;  %v288_v61 = vmul.f32 %v572_v56, %v748_v59 }
 0x1e4   :  { %v574_v62 = vpop.eup %573  ;;  %v339_v0 = vmul.f32 1.442695, %v334_v57  ;;  %291 = vadd.xlane.f32.xlu0 %v290_v60 }
 0x1e5   :  { %v293_v3 = vsel %vm268_vm11, %v288_v61, 0.0  ;;  %v341_v4 = vmul.f32 %v574_v62, %v751_v63 }
 0x1e6   :  { %579 = vpow2.f32 %v339_v0 }
 0x1e7   :  { %v344_v6 = vsel %vm268_vm11, %v341_v4, 0.0 }
 0x1e8   :  { %294 = vadd.xlane.f32.xlu0 %v293_v3  ;;  %v576_v5 = vpop.eup %575 }
 0x1e9   :  { %v807_v59 = vmul.f32 %v576_v5, %v754_v2 }
 0x1eb   :  { %v347_v13 = vsel %vm268_vm11, %v807_v59, 0.0 }
 0x1ec   :  { %v578_v58 = vpop.eup %577  ;;  %345 = vadd.xlane.f32.xlu0 %v344_v6 }
 0x1ed   :  { %v289_v7 = vmul.f32 %v578_v58, %v773_v18 }
 0x1ef   :  { %v296_v8 = vsel %vm268_vm11, %v289_v7, 0.0 }
 0x1f0   :  { %v580_v10 = vpop.eup %579  ;;  %297 = vadd.xlane.f32.xlu0 %v296_v8 }
 0x1f1   :  { %v343_v12 = vmul.f32 %v580_v10, %v258_v25 }
 0x1f3   :  { %v350_v63 = vsel %vm268_vm11, %v343_v12, 0.0 }
 0x1f4   :  { %348 = vadd.xlane.f32.xlu0 %v347_v13  ;;  %351 = vadd.xlane.f32.xlu1 %v350_v63 }
 0x271   :  { %v292_v15 = vpop.xlane.xlu0 %291 }
 0x272   :  { %v299_v16 = vadd.f32 1e-06, %v292_v15 }
 0x274   :  { %581 = vrcp.f32 %v299_v16 }
 0x275   :  { %v295_v19 = vpop.xlane.xlu0 %294 }
 0x276   :  { %v300_v18 = vadd.f32 1e-06, %v295_v19 }
 0x278   :  { %583 = vrcp.f32 %v300_v18 }
 0x279   :  { %v346_v20 = vpop.xlane.xlu0 %345 }
 0x27a   :  { %v353_v21 = vadd.f32 1e-06, %v346_v20 }
 0x27c   :  { %585 = vrcp.f32 %v353_v21 }
 0x27d   :  { %v298_v2 = vpop.xlane.xlu0 %297 }
 0x27e   :  { %v582_v22 = vpop.eup %581  ;;  %v301_v23 = vadd.f32 1e-06, %v298_v2 }
 0x27f   :  { %v305_v24 = vmul.f32 %v582_v22, %v299_v16 }
 0x280   :  { %587 = vrcp.f32 %v301_v23 }
 0x281   :  { %v308_v25 = vsub.f32 2.0, %v305_v24  ;;  %v352_v26 = vpop.xlane.xlu1 %351  ;;  %v349_v27 = vpop.xlane.xlu0 %348 }
 0x282   :  { %v584_v28 = vpop.eup %583  ;;  %v355_v31 = vadd.f32 1e-06, %v352_v26  ;;  %v354_v32 = vadd.f32 1e-06, %v349_v27  ;;  %v453_v27 = vand.u32 127, %v193_v36 }
 0x283   :  { %v311_v33 = vmul.f32 %v582_v22, %v308_v25  ;;  %v306_v34 = vmul.f32 %v584_v28, %v300_v18 }
 0x284   :  { %589 = vrcp.f32 %v355_v31  ;;  %vm460_vm13 = vcmp.eq.s32.totalorder %v453_v27, 1  ;;  %vm454_vm14 = vcmp.eq.s32.totalorder %v453_v27, 0  ;;  %vm469_vm15 = vcmp.eq.s32.totalorder %v453_v27, 2 }
 0x285   :  { %v309_v35 = vsub.f32 2.0, %v306_v34  ;;  %591 = vrcp.f32 %v354_v32  ;;  %v314_v37 = vmul.f32 %v311_v33, %v287_v55  ;;  %vm478_vm0 = vcmp.eq.s32.totalorder %v453_v27, 3 }
 0x286   :  { %v586_v38 = vpop.eup %585 }
 0x287   :  { %v312_v39 = vmul.f32 %v584_v28, %v309_v35  ;;  %v359_v40 = vmul.f32 %v586_v38, %v353_v21  ;;  %v371_v41 = vmul.f32 %v314_v37, %v757_v9 }
 0x289   :  { %v362_v42 = vsub.f32 2.0, %v359_v40  ;;  %v374_v43 = vsel %vm268_vm11, %v371_v41, 0.0  ;;  %v315_v44 = vmul.f32 %v312_v39, %v288_v61  ;;  %v520_v40 = vsel %vm454_vm14, 1.0, %v658_v1 }
 0x28a   :  { %v588_v45 = vpop.eup %587  ;;  %375 = vadd.xlane.f32.xlu0 %v374_v43 }
 0x28b   :  { %v365_v46 = vmul.f32 %v586_v38, %v362_v42  ;;  %v307_v47 = vmul.f32 %v588_v45, %v301_v23  ;;  %v372_v48 = vmul.f32 %v315_v44, %v763_v14  ;;  %v521_v38 = vsel %vm460_vm13, 1.0, %v658_v1 }
 0x28d   :  { %v310_v49 = vsub.f32 2.0, %v307_v47  ;;  %v377_v50 = vsel %vm268_vm11, %v372_v48, 0.0  ;;  %v368_v51 = vmul.f32 %v365_v46, %v341_v4  ;;  %v522_v46 = vsel %vm469_vm15, 1.0, %v658_v1 }
 0x28e   :  { %v590_v52 = vpop.eup %589  ;;  %378 = vadd.xlane.f32.xlu1 %v377_v50  ;;  %v523_v50 = vsel %vm478_vm0, 1.0, %v658_v1 }
 0x28f   :  { %v592_v53 = vpop.eup %591  ;;  %v313_v54 = vmul.f32 %v588_v45, %v310_v49  ;;  %v361_v55 = vmul.f32 %v590_v52, %v355_v31  ;;  %v383_v9 = vmul.f32 %v368_v51, %v760_v11 }
 0x290   :  { %v360_v56 = vmul.f32 %v592_v53, %v354_v32 }
 0x291   :  { %v364_v57 = vsub.f32 2.0, %v361_v55  ;;  %v386_v60 = vsel %vm268_vm11, %v383_v9, 0.0  ;;  %v316_v61 = vmul.f32 %v313_v54, %v289_v7 }
 0x292   :  { %v363_v62 = vsub.f32 2.0, %v360_v56  ;;  %387 = vadd.xlane.f32.xlu1 %v386_v60 }
 0x293   :  { %v367_v0 = vmul.f32 %v590_v52, %v364_v57  ;;  %v373_v14 = vmul.f32 %v316_v61, %v785_v29 }
 0x294   :  { %v366_v3 = vmul.f32 %v592_v53, %v363_v62 }
 0x295   :  { %v380_v4 = vsel %vm268_vm11, %v373_v14, 0.0  ;;  %v370_v5 = vmul.f32 %v367_v0, %v343_v12 }
 0x296   :  { %381 = vadd.xlane.f32.xlu0 %v380_v4  ;;  %v369_v6 = vmul.f32 %v366_v3, %v807_v59 }
 0x297   :  { %v385_v58 = vmul.f32 %v370_v5, %v787_v30 }
 0x298   :  { %v384_v11 = vmul.f32 %v369_v6, %v769_v17 }
 0x299   :  { %v392_v8 = vsel %vm268_vm11, %v385_v58, 0.0 }
 0x29a   :  { %393 = vadd.xlane.f32.xlu1 %v392_v8  ;;  %v389_v7 = vsel %vm268_vm11, %v384_v11, 0.0 }
 0x29b   :  { %390 = vadd.xlane.f32.xlu0 %v389_v7 }
 0x317   :  { %v376_v29 = vpop.xlane.xlu0 %375 }
 0x318   :  { %v457_v48 = vmul.f32 %v520_v40, %v376_v29 }
 0x31b   :  { %v825_v10 = vpop.xlane.xlu1 %378 }
 0x31f   :  { %v388_v13 = vpop.xlane.xlu1 %387 }
 0x320   :  { %v395_v63 = vsub.f32 %v376_v29, %v388_v13  ;;  %vm443_vm1 = vcmp.ge.f32.partialorder %v388_v13, %v376_v29  ;;  %v463_v44 = vmul.f32 %v521_v38, %v388_v13 }
 0x321   :  { %v517_v51 = vsel %vm443_vm1, 1.0, %v658_v1 }
 0x322   :  { %v401_v15 = vand.u32 2147483647, %v395_v63  ;;  %v398_v43 = vmax.f32 %v395_v63, 0.0  ;;  %v466_v53 = vadd.f32 %v463_v44, %v457_v48  ;;  %v481_v61 = vmul.f32 %v523_v50, %v517_v51 }
 0x323   :  { %v827_v12 = vpop.xlane.xlu0 %381 }
 0x324   :  { %v404_v16 = vsub.f32 0.0, %v401_v15  ;;  %v459_v29 = vmul.f32 %v520_v40, %v827_v12  ;;  %v458_v15 = vmul.f32 %v520_v40, %v825_v10 }
 0x326   :  { %v407_v59 = vmul.f32 1.442695, %v404_v16 }
 0x327   :  { %v829_v19 = vpop.xlane.xlu1 %393 }
 0x328   :  { %593 = vpow2.f32 %v407_v59  ;;  %v833_v17 = vsub.f32 %v827_v12, %v829_v19  ;;  %v835_v30 = vpop.xlane.xlu0 %390  ;;  %vm445_vm3 = vcmp.ge.f32.partialorder %v829_v19, %v827_v12  ;;  %v465_v62 = vmul.f32 %v521_v38, %v829_v19 }
 0x329   :  { %v839_v18 = vsub.f32 %v825_v10, %v835_v30  ;;  %vm444_vm4 = vcmp.ge.f32.partialorder %v835_v30, %v825_v10  ;;  %v464_v7 = vmul.f32 %v521_v38, %v835_v30  ;;  %v519_v16 = vsel %vm445_vm3, 1.0, %v658_v1 }
 0x32a   :  { %v403_v20 = vand.u32 2147483647, %v833_v17  ;;  %v400_v14 = vmax.f32 %v833_v17, 0.0  ;;  %v468_v17 = vadd.f32 %v465_v62, %v459_v29 }
 0x32b   :  { %v402_v21 = vand.u32 2147483647, %v839_v18  ;;  %v399_v8 = vmax.f32 %v839_v18, 0.0  ;;  %v518_v18 = vsel %vm444_vm4, 1.0, %v658_v1 }
 0x32c   :  { %v406_v2 = vsub.f32 0.0, %v403_v20 }
 0x32d   :  { %v405_v22 = vsub.f32 0.0, %v402_v21  ;;  %v467_v21 = vadd.f32 %v464_v7, %v458_v15 }
 0x32e   :  { %v411_v23 = vmul.f32 1.442695, %v406_v2 }
 0x32f   :  { %v409_v24 = vmul.f32 1.442695, %v405_v22 }
 0x330   :  { %595 = vpow2.f32 %v411_v23  ;;  %v483_v23 = vmul.f32 %v523_v50, %v519_v16 }
 0x331   :  { %597 = vpow2.f32 %v409_v24 }
 0x332   :  { %v594_v25 = vpop.eup %593 }
 0x333   :  { %v413_v26 = vadd.f32 1.0, %v594_v25  ;;  %v416_v28 = vmul.f32 -0.5, %v594_v25  ;;  %v419_v37 = vand.u32 2147483647, %v594_v25 }
 0x335   :  { %599 = vlog2.f32 %v413_v26  ;;  %v417_v34 = vadd.f32 1.0, %v416_v28  ;;  %vm420_vm2 = vcmp.lt.f32.partialorder %v419_v37, 0.0004427343 }
 0x337   :  { %v418_v36 = vmul.f32 %v594_v25, %v417_v34  ;;  %v482_v25 = vmul.f32 %v523_v50, %v518_v18 }
 0x33a   :  { %v596_v31 = vpop.eup %595 }
 0x33b   :  { %v598_v32 = vpop.eup %597  ;;  %v431_v33 = vadd.f32 1.0, %v596_v31  ;;  %v434_v42 = vmul.f32 -0.5, %v596_v31  ;;  %v437_v55 = vand.u32 2147483647, %v596_v31 }
 0x33c   :  { %v422_v35 = vadd.f32 1.0, %v598_v32  ;;  %v425_v45 = vmul.f32 -0.5, %v598_v32  ;;  %v428_v56 = vand.u32 2147483647, %v598_v32 }
 0x33d   :  { %601 = vlog2.f32 %v431_v33  ;;  %v435_v52 = vadd.f32 1.0, %v434_v42  ;;  %vm438_vm5 = vcmp.lt.f32.partialorder %v437_v55, 0.0004427343 }
 0x33e   :  { %603 = vlog2.f32 %v422_v35  ;;  %v426_v9 = vadd.f32 1.0, %v425_v45  ;;  %vm429_vm6 = vcmp.lt.f32.partialorder %v428_v56, 0.0004427343 }
 0x33f   :  { %v600_v39 = vpop.eup %599  ;;  %v436_v4 = vmul.f32 %v596_v31, %v435_v52 }
 0x340   :  { %v415_v41 = vmul.f32 0.6931472, %v600_v39  ;;  %v427_v58 = vmul.f32 %v598_v32, %v426_v9 }
 0x342   :  { %v421_v47 = vsel %vm420_vm2, %v418_v36, %v415_v41 }
 0x343   :  { %v440_v49 = vadd.f32 %v421_v47, %v398_v43 }
 0x345   :  { %v472_v54 = vmul.f32 %v522_v46, %v440_v49 }
 0x347   :  { %v602_v57 = vpop.eup %601  ;;  %v475_v60 = vadd.f32 %v472_v54, %v466_v53 }
 0x348   :  { %v604_v0 = vpop.eup %603  ;;  %v433_v3 = vmul.f32 0.6931472, %v602_v57 }
 0x349   :  { %v484_v5 = vadd.f32 %v481_v61, %v475_v60  ;;  %v424_v6 = vmul.f32 0.6931472, %v604_v0 }
 0x34a   :  { %v439_v11 = vsel %vm438_vm5, %v436_v4, %v433_v3 }
 0x34b   :  { %487 = vst [vmem:[#allocation5] sm:$0xff] %v484_v5  ;;  %v442_v13 = vadd.f32 %v439_v11, %v400_v14  ;;  %v430_v63 = vsel %vm429_vm6, %v427_v58, %v424_v6 }
 0x34c   :  { %v441_v59 = vadd.f32 %v430_v63, %v399_v8 }
 0x34d   :  { %v474_v20 = vmul.f32 %v522_v46, %v442_v13 }
 0x34e   :  { %v473_v2 = vmul.f32 %v522_v46, %v441_v59 }
 0x34f   :  { %v477_v22 = vadd.f32 %v474_v20, %v468_v17 }
 0x350   :  { %v476_v24 = vadd.f32 %v473_v2, %v467_v21 }
 0x351   :  { %v486_v26 = vadd.f32 %v483_v23, %v477_v22 }
 0x352   :  { %v485_v27 = vadd.f32 %v482_v25, %v476_v24 }
 0x353   :  { %489 = vst [vmem:[#allocation5 + $0x10] sm:$0xff] %v486_v26 }
 0x354   :  { %488 = vst [vmem:[#allocation5 + $0x8] sm:$0xff] %v485_v27 }
 0x355   :  { %638 = shalt.err (!%p635_p12)
}
 0x356   :  { %s639_s18 = scalar_lea.hbm %s886_s4, 384 }
 0x357   :  { %p640_p13 = scmp.ne.s32.totalorder %s886_s4, %s639_s18  ;;  %p643_p0 = scmp.lt.u32.totalorder %s639_s18, %s886_s4 }
 0x359   :  { %p645_p1 = pnand %p643_p0, %p640_p13 }
 0x35b   :  { %648 = shalt.err (!%p645_p1)
}
 0x35c   :  { %501 = dma.vmem_to_hbm [thread:$0]  %s496_s14, 384, %s886_s4, [#allocation4], %s654_s25, %s654_s25, %s655_s26  }
 0x35d   :  { %651 = dma.done.wait [#allocation4], 384  }
 0x35e   :  { %652 = vsyncadd [#allocation4], 4294966912 }
 0x35f   :  { %505 = vsyncpa [#allocation3], 1 }
 0x360   :  { %506 = vsyncpa [#allocation4], 1 }

</bundles_post_ra>
